<compile_context>
chip_gen: v7x
topology: tpu7x:2x2x1
jax: 0.10.0
libtpu: 0.0.40
codegen_flags: <defaults>
</compile_context>

<pallas_src>
import jax
import jax.numpy as jnp
from jax.experimental import pallas as pl
from jax.experimental.pallas import tpu as pltpu


# Per-buffer tile cap.  Double-buffered in + out blocks peak at ~4 x 4 MiB =
# 16 MiB of VMEM, comfortably inside the 32 MiB limit requested below on
# every generation (v5e/v6e: 128 MiB physical, v7x: 64 MiB physical).
_TILE_BYTES_CAP = 4 * 1024 * 1024
_VMEM_LIMIT_BYTES = 32 * 1024 * 1024


def _copy_kernel(x_ref, o_ref):
    # Identity copy of the current tile -- the entire "compute" of a reshape.
    o_ref[...] = x_ref[...]


def _sublane_multiple(itemsize):
    # Sub-32-bit dtypes pack along sublanes: keep row tiles on packed-layout
    # boundaries (16 rows for 2-byte, 32 rows for 1-byte dtypes).
    return {1: 32, 2: 16}.get(itemsize, 8)


def _pick_tile_rows(rows, lanes, itemsize, sub):
    """Largest row tile that (a) respects the dtype sublane multiple,
    (b) stays under the per-buffer VMEM cap, and (c) prefers exact divisors
    of `rows` so there is no partial tail block."""
    if rows * lanes * itemsize <= _TILE_BYTES_CAP:
        return rows            # whole slab is one block (full-dims exemption)
    max_rows = max(sub, (_TILE_BYTES_CAP // (lanes * itemsize)) // sub * sub)
    t = max_rows
    while t >= sub:
        if rows % t == 0:
            return t           # exact divisor -> no masked tail tile
        t -= sub
    return max_rows            # cdiv grid with a partial (masked) tail block


def _pallas_copy_2d(x2d, tile_rows, *, alias):
    """Tiled identity copy of a (rows, lanes) lane-dense slab."""
    rows, lanes = x2d.shape
    itemsize = jnp.dtype(x2d.dtype).itemsize
    grid = (pl.cdiv(rows, tile_rows),)
    return pl.pallas_call(
        _copy_kernel,
        out_shape=jax.ShapeDtypeStruct((rows, lanes), x2d.dtype),
        grid_spec=pltpu.PrefetchScalarGridSpec(
            num_scalar_prefetch=0,
            grid=grid,
            in_specs=[pl.BlockSpec((tile_rows, lanes), lambda i: (i, 0))],
            out_specs=pl.BlockSpec((tile_rows, lanes), lambda i: (i, 0)),
        ),
        compiler_params=pltpu.CompilerParams(
            dimension_semantics=("parallel",),
            vmem_limit_bytes=_VMEM_LIMIT_BYTES,
        ),
        cost_estimate=pl.CostEstimate(
            flops=0,
            transcendentals=0,
            bytes_accessed=2 * rows * lanes * itemsize,
        ),
        # Main perf lever: output reuses the input HBM buffer (XLA can donate
        # it inside a jitted graph and elide the copy entirely).
        input_output_aliases=({0: 0} if alias else {}),
    )(x2d)


def _infer_shape(in_shape, shape):
    total = 1
    for d in in_shape:
        total *= d
    shape = tuple(int(d) for d in shape)
    if -1 in shape:
        assert shape.count(-1) == 1, "only one -1 allowed in view shape"
        known = 1
        for d in shape:
            if d != -1:
                known *= d
        assert known > 0 and total % known == 0, (
            f"cannot view {in_shape} as {shape}")
        shape = tuple(total // known if d == -1 else d for d in shape)
    prod = 1
    for d in shape:
        prod *= d
    assert prod == total, f"cannot view {in_shape} as {shape}"
    return shape, total


def reshape_forward(x, shape):
    """Pallas-backed equivalent of torch.Tensor.view(shape) on a contiguous
    tensor (row-major order matches jnp.reshape exactly)."""
    shape, total = _infer_shape(x.shape, shape)
    itemsize = jnp.dtype(x.dtype).itemsize
    sub = _sublane_multiple(itemsize)

    # Widest lane-dense slab (multiple of 128 lanes) dividing the element count.
    lanes = next((c for c in (2048, 1024, 512, 256, 128) if total % c == 0), 0)

    if lanes:
        rows = total // lanes
        tile_rows = _pick_tile_rows(rows, lanes, itemsize, sub)
        x2d = jnp.reshape(x, (rows, lanes))                 # metadata only
        y2d = _pallas_copy_2d(x2d, tile_rows, alias=True)   # hot path
        return jnp.reshape(y2d, shape)                      # metadata only

    # Tail path: element count not a multiple of 128.  Pad the flat stream to
    # a (rows_p, 128) slab with a sublane-aligned row count, copy through the
    # same tiled kernel, slice back.  (Padded shapes differ, so no aliasing.)
    lanes = 128
    rows_p = ((pl.cdiv(total, lanes) + sub - 1) // sub) * sub
    flat = jnp.pad(jnp.reshape(x, (total,)), (0, rows_p * lanes - total))
    x2d = jnp.reshape(flat, (rows_p, lanes))
    tile_rows = _pick_tile_rows(rows_p, lanes, itemsize, sub)
    y2d = _pallas_copy_2d(x2d, tile_rows, alias=False)
    return jnp.reshape(jnp.reshape(y2d, (rows_p * lanes,))[:total], shape)


if __name__ == "__main__":
    key0, key1 = jax.random.split(jax.random.PRNGKey(0))

    # Main case (matches the module usage): view (2, 4, 16, 16) -> (2, 4, 256).
    x = jax.random.normal(key0, (2, 4, 16, 16), dtype=jnp.float32)
    target_shape = (2, 4, 256)
    y = jax.block_until_ready(reshape_forward(x, target_shape))
    ref = jnp.reshape(x, target_shape)
    assert y.shape == target_shape
    assert y.dtype == x.dtype
    assert bool(jnp.array_equal(y, ref))

    # Tail path: element count not divisible by 128, plus -1 inference.
    x2 = jax.random.normal(key1, (3, 5, 6), dtype=jnp.float32)
    y2 = jax.block_until_ready(reshape_forward(x2, (5, -1)))
    assert y2.shape == (5, 18)
    assert bool(jnp.array_equal(y2, jnp.reshape(x2, (5, 18))))

    print("KERNEL_OK")
</pallas_src>

<mosaic_0001>
module attributes {stable_mosaic.version = 11 : i64} {
  func.func @_copy_kernel(%arg0: i32, %arg1: memref<1x2048xf32, #tpu.memory_space<vmem>>, %arg2: memref<1x2048xf32, #tpu.memory_space<vmem>>) attributes {dimension_semantics = [#tpu.dimension_semantics<parallel>], iteration_bounds = array<i64: 1>, scalar_prefetch = 0 : i64, scratch_operands = 0 : i64, tpu.core_type = #tpu.core_type<tc>, window_params = [{transform_indices = @transform_0, window_bounds = array<i64: 1, 2048>}, {transform_indices = @transform_1, window_bounds = array<i64: 1, 2048>}]} {
    %c0 = arith.constant 0 : index
    %c0_0 = arith.constant 0 : index
    %0 = vector.load %arg1[%c0, %c0_0] : memref<1x2048xf32, #tpu.memory_space<vmem>>, vector<1x2048xf32>
    %c0_1 = arith.constant 0 : index
    %c0_2 = arith.constant 0 : index
    %1 = vector.load %arg2[%c0_1, %c0_2] : memref<1x2048xf32, #tpu.memory_space<vmem>>, vector<1x2048xf32>
    tpu.vector_store %arg2[%c0_1, %c0_2], %0 {strides = array<i32>} : memref<1x2048xf32, #tpu.memory_space<vmem>>, vector<1x2048xf32>,
    return
  }
  func.func @transform_0(%arg0: i32) -> (i32, i32) {
    %c0_i32 = arith.constant 0 : i32
    %c0_i32_0 = arith.constant 0 : i32
    return %arg0, %c0_i32 : i32, i32
  }
  func.func @transform_1(%arg0: i32) -> (i32, i32) {
    %c0_i32 = arith.constant 0 : i32
    %c0_i32_0 = arith.constant 0 : i32
    return %arg0, %c0_i32 : i32, i32
  }
}

</mosaic_0001>

<bundles_post_ra>
// kernel: tpu_custom_call.1
= control target key start
LH: loop header
LB: loop body
LE: loop exit
PB: predicated region body
PF: predicated region fallthrough
CT: control target
= control target key end

     0   :  { %6 = vsyncpa [#allocation3], 0  ;;  %s126_s0 = inlined_call_operand.hbm [shape: f32[1,2048], index: 0, kind: input, shape index: {}, may-alias: {0,1}]   ;;  %s127_s1 = inlined_call_operand.hbm [shape: f32[1,2048], index: 1, kind: output, shape index: {}, may-alias: {0,1}]  }
   0x1   :  { %7 = vsyncpa [#allocation4], 0  ;;  %s90_s6 = smov [#allocation2]   ;;  %s42_s10 = scalar_lea.hbm %s126_s0, 256 }
   0x2   :  { %s14_s7 = sshll.u32 %s90_s6, 4  ;;  %p43_p0 = scmp.ne.s32.totalorder %s126_s0, %s42_s10  ;;  %s15_s7 = int_to_ptr.vmem [resolvable:$true] %s14_s7 }
   0x3   :  { %p46_p1 = scmp.lt.u32.totalorder %s42_s10, %s126_s0 }
   0x5   :  { %p48_p2 = pnand %p46_p1, %p43_p0 }
   0x7   :  { %51 = shalt.err (!%p48_p2)
}
   0x8   :  { %s52_s15 = scalar_lea.vmem %s15_s7, 256  ;;  %p57_p4 = scmp.lt.s32.totalorder %s15_s7, %s15_s7 }
   0x9   :  { %p53_p3 = scmp.ne.s32.totalorder %s15_s7, %s52_s15  ;;  %p58_p5 = scmp.lt.s32.totalorder %s52_s15, %s52_s15 }
   0xb   :  { %p59_p6 = por %p58_p5, %p57_p4 }
   0xd   :  { %p60_p7 = pnand %p59_p6, %p53_p3 }
   0xf   :  { %63 = shalt.err (!%p60_p7)
}
  0x10   :  { %17 = dma.hbm_to_vmem [thread:$0]  %s126_s0, 256, %s15_s7, [#allocation3]  }
  0x11   :  { %86 = dma.done.wait [#allocation3], 256  }
  0x12   :  { %87 = vsyncadd [#allocation3], 4294967040  ;;  %s91_s18 = smov [#allocation5]   ;;  %v21_v0 = vld [vmem:[#allocation2] sm:$0xff]  ;;  %v22_v1 = vld [vmem:[#allocation2 + $0x8] sm:$0xff] }
  0x13   :  { %s31_s19 = sshll.u32 %s91_s18, 4  ;;  %23 = vst [vmem:[#allocation5] sm:$0xff] %v21_v0  ;;  %24 = vst [vmem:[#allocation5 + $0x8] sm:$0xff] %v22_v1  ;;  %s32_s19 = int_to_ptr.vmem [resolvable:$true] %s31_s19 }
  0x14   :  { %s64_s20 = scalar_lea.vmem %s32_s19, 256  ;;  %p69_p9 = scmp.lt.s32.totalorder %s32_s19, %s32_s19 }
  0x15   :  { %p65_p8 = scmp.ne.s32.totalorder %s32_s19, %s64_s20  ;;  %p70_p10 = scmp.lt.s32.totalorder %s64_s20, %s64_s20 }
  0x17   :  { %p71_p11 = por %p70_p10, %p69_p9 }
  0x19   :  { %p72_p12 = pnand %p71_p11, %p65_p8 }
  0x1b   :  { %75 = shalt.err (!%p72_p12)
}
  0x1c   :  { %s76_s0 = scalar_lea.hbm %s127_s1, 256 }
  0x1d   :  { %p77_p13 = scmp.ne.s32.totalorder %s127_s1, %s76_s0  ;;  %p80_p0 = scmp.lt.u32.totalorder %s76_s0, %s127_s1 }
  0x1f   :  { %p82_p1 = pnand %p80_p0, %p77_p13 }
  0x21   :  { %85 = shalt.err (!%p82_p1)
}
  0x22   :  { %34 = dma.vmem_to_hbm [thread:$0]  %s32_s19, 256, %s127_s1, [#allocation4]  }
  0x23   :  { %88 = dma.done.wait [#allocation4], 256  }
  0x24   :  { %89 = vsyncadd [#allocation4], 4294967040 }
  0x25   :  { %38 = vsyncpa [#allocation3], 1 }
  0x26   :  { %39 = vsyncpa [#allocation4], 1 }

</bundles_post_ra>
